<compile_context>
chip_gen: v5e
topology: v5e:2x2
jax: 0.10.0
libtpu: 0.0.40
codegen_flags: <defaults>
</compile_context>

<pallas_src>
import functools

import jax
import jax.numpy as jnp
from jax import lax
from jax.experimental import pallas as pl
from jax.experimental.pallas import tpu as pltpu


def _cls_head_kernel(x_ref, w_ref, b_ref, o_ref, acc_ref):
    """x_ref: (tb, tk), w_ref: (to, tk) [PyTorch (O, D) layout], b_ref: (1, to),
    o_ref: (tb, to), acc_ref: f32 (tb, to) accumulator scratch."""
    k = pl.program_id(2)

    @pl.when(k == 0)
    def _init():
        acc_ref[...] = jnp.zeros_like(acc_ref)

    # (tb, tk) . (to, tk) contracted over the D axis of both -> (tb, to).
    acc_ref[...] += lax.dot_general(
        x_ref[...], w_ref[...],
        dimension_numbers=(((1,), (1,)), ((), ())),
        preferred_element_type=jnp.float32,
    )

    @pl.when(k == pl.num_programs(2) - 1)
    def _finalize():
        o_ref[...] = (acc_ref[...] + b_ref[...]).astype(o_ref.dtype)


def _round_up(n, m):
    return ((n + m - 1) // m) * m


@functools.partial(jax.jit, static_argnames=("tile_b", "tile_o", "tile_k", "use_bf16"))
def classification_layer(x, weight, bias, *, tile_b=256, tile_o=512, tile_k=512,
                         use_bf16=False):
    """Pallas equivalent of ClassificationLayer.forward.

    Args:
      x:      (B, S, D) float32
      weight: (O, D) float32  -- PyTorch nn.Linear weight layout (NOT transposed)
      bias:   (O,)   float32
      use_bf16: optionally feed the MXU in bf16 (f32 accumulation kept).
    Returns:
      (B, O) float32
    """
    B, S, D = x.shape
    O = weight.shape[0]

    # CLS token only -- avoids DMAing (or padding) the S-long sequence axis.
    x0 = x[:, 0, :]                                  # (B, D)

    # Pad to TPU-friendly shapes (sublane multiple of 8, lane multiple of 128),
    # then round up to whole tiles. Tiles are clamped to the (rounded) problem
    # size so tiny batches / heads don't over-pad.
    tb = _round_up(min(tile_b, _round_up(B, 8)), 8)
    tk = _round_up(min(tile_k, _round_up(D, 128)), 128)
    to = _round_up(min(tile_o, _round_up(O, 128)), 128)
    Bp = _round_up(B, tb)
    Dp = _round_up(D, tk)
    Op = _round_up(O, to)

    x0p = jnp.pad(x0, ((0, Bp - B), (0, Dp - D)))
    wp = jnp.pad(weight, ((0, Op - O), (0, Dp - D)))      # keep (O, D) layout
    bp = jnp.pad(bias, (0, Op - O)).reshape(1, Op)

    if use_bf16:
        x0p = x0p.astype(jnp.bfloat16)
        wp = wp.astype(jnp.bfloat16)

    grid = (Bp // tb, Op // to, Dp // tk)
    bytes_per_el = 2 if use_bf16 else 4

    out = pl.pallas_call(
        _cls_head_kernel,
        out_shape=jax.ShapeDtypeStruct((Bp, Op), x.dtype),
        grid_spec=pltpu.PrefetchScalarGridSpec(
            num_scalar_prefetch=0,
            grid=grid,
            in_specs=[
                pl.BlockSpec((tb, tk), lambda i, j, k: (i, k)),   # x0 tile
                pl.BlockSpec((to, tk), lambda i, j, k: (j, k)),   # W tile (O, D)
                pl.BlockSpec((1, to), lambda i, j, k: (0, j)),    # bias tile
            ],
            out_specs=pl.BlockSpec((tb, to), lambda i, j, k: (i, j)),
            scratch_shapes=[pltpu.VMEM((tb, to), jnp.float32)],
        ),
        compiler_params=pltpu.CompilerParams(
            dimension_semantics=("parallel", "parallel", "arbitrary")),
        cost_estimate=pl.CostEstimate(
            flops=2 * Bp * Op * Dp,
            transcendentals=0,
            bytes_accessed=bytes_per_el * (Bp * Dp + Op * Dp) + 4 * (Bp * Op + Op),
        ),
    )(x0p, wp, bp)

    return out[:B, :O]


def reference(x, weight, bias):
    return x[:, 0, :] @ weight.T + bias


if __name__ == "__main__":
    key = jax.random.PRNGKey(0)

    # --- Small shapes consistent with the module's forward (batch, seq, d_model).
    B, S, D, O = 2, 8, 32, 2
    kx, kw, kb, k2 = jax.random.split(key, 4)
    x = jax.random.normal(kx, (B, S, D), dtype=jnp.float32)
    # Parameter init mirroring the module: weight ~ N(0, 0.02), bias ~ N(0, 1).
    weight = 0.02 * jax.random.normal(kw, (O, D), dtype=jnp.float32)
    bias = jax.random.normal(kb, (O,), dtype=jnp.float32)

    out = jax.block_until_ready(classification_layer(x, weight, bias))
    ref = reference(x, weight, bias)
    assert out.shape == (B, O)
    assert jnp.allclose(out, ref, atol=1e-5, rtol=1e-5), "mismatch vs reference (small)"

    # --- Module-default d_model=300 to exercise the K-reduction grid axis +
    #     accumulator init/finalize path (Dp // tk = 3 K-steps). Still tiny.
    B2, S2, D2, O2 = 16, 8, 300, 2
    kx2, kw2, kb2 = jax.random.split(k2, 3)
    x2 = jax.random.normal(kx2, (B2, S2, D2), dtype=jnp.float32)
    w2 = 0.02 * jax.random.normal(kw2, (O2, D2), dtype=jnp.float32)
    b2 = jax.random.normal(kb2, (O2,), dtype=jnp.float32)

    out2 = jax.block_until_ready(
        classification_layer(x2, w2, b2, tile_k=128))
    ref2 = reference(x2, w2, b2)
    assert out2.shape == (B2, O2)
    assert jnp.allclose(out2, ref2, atol=1e-5, rtol=1e-5), "mismatch vs reference (large)"

    print("KERNEL_OK")
</pallas_src>

<mosaic_0001>
module attributes {stable_mosaic.version = 11 : i64} {
  func.func @_cls_head_kernel(%arg0: i32, %arg1: i32, %arg2: i32, %arg3: memref<8x128xf32, #tpu.memory_space<vmem>>, %arg4: memref<128x128xf32, #tpu.memory_space<vmem>>, %arg5: memref<1x128xf32, #tpu.memory_space<vmem>>, %arg6: memref<8x128xf32, #tpu.memory_space<vmem>>, %arg7: memref<8x128xf32, #tpu.memory_space<vmem>>) attributes {dimension_semantics = [#tpu.dimension_semantics<parallel>, #tpu.dimension_semantics<parallel>, #tpu.dimension_semantics<arbitrary>], iteration_bounds = array<i64: 1, 1, 1>, scalar_prefetch = 0 : i64, scratch_operands = 1 : i64, tpu.core_type = #tpu.core_type<tc>, window_params = [{transform_indices = @transform_0, window_bounds = array<i64: 8, 128>}, {transform_indices = @transform_1, window_bounds = array<i64: 128, 128>}, {transform_indices = @transform_2, window_bounds = array<i64: 1, 128>}, {transform_indices = @transform_3, window_bounds = array<i64: 8, 128>}]} {
    %c0_i32 = arith.constant 0 : i32
    %0 = arith.cmpi eq, %arg2, %c0_i32 : i32
    %1 = arith.extui %0 : i1 to i32
    %c0_i32_0 = arith.constant 0 : i32
    %2 = arith.cmpi ne, %1, %c0_i32_0 : i32
    scf.if %2 {
      %cst_10 = arith.constant 0.000000e+00 : f32
      %12 = vector.broadcast %cst_10 : f32 to vector<8x128xf32>
      %c0_11 = arith.constant 0 : index
      %c0_12 = arith.constant 0 : index
      %13 = vector.load %arg7[%c0_11, %c0_12] : memref<8x128xf32, #tpu.memory_space<vmem>>, vector<8x128xf32>
      tpu.vector_store %arg7[%c0_11, %c0_12], %12 {strides = array<i32>} : memref<8x128xf32, #tpu.memory_space<vmem>>, vector<8x128xf32>,
    } else {
    }
    %c0 = arith.constant 0 : index
    %c0_1 = arith.constant 0 : index
    %3 = vector.load %arg7[%c0, %c0_1] : memref<8x128xf32, #tpu.memory_space<vmem>>, vector<8x128xf32>
    %c0_2 = arith.constant 0 : index
    %c0_3 = arith.constant 0 : index
    %4 = vector.load %arg3[%c0_2, %c0_3] : memref<8x128xf32, #tpu.memory_space<vmem>>, vector<8x128xf32>
    %c0_4 = arith.constant 0 : index
    %c0_5 = arith.constant 0 : index
    %5 = vector.load %arg4[%c0_4, %c0_5] : memref<128x128xf32, #tpu.memory_space<vmem>>, vector<128x128xf32>
    %cst = arith.constant dense<0.000000e+00> : vector<8x128xf32>
    %6 = tpu.matmul %4, %5, %cst {dimension_numbers = #tpu.dot_dimension_numbers<[1], [1], [0], [0], [0, 0, 1, 0], [], []>} : vector<8x128xf32>, vector<128x128xf32>, vector<8x128xf32> -> vector<8x128xf32>
    %7 = arith.addf %3, %6 : vector<8x128xf32>
    %c0_6 = arith.constant 0 : index
    %c0_7 = arith.constant 0 : index
    %8 = vector.load %arg7[%c0_6, %c0_7] : memref<8x128xf32, #tpu.memory_space<vmem>>, vector<8x128xf32>
    tpu.vector_store %arg7[%c0_6, %c0_7], %7 {strides = array<i32>} : memref<8x128xf32, #tpu.memory_space<vmem>>, vector<8x128xf32>,
    %c0_i32_8 = arith.constant 0 : i32
    %9 = arith.cmpi eq, %arg2, %c0_i32_8 : i32
    %10 = arith.extui %9 : i1 to i32
    %c0_i32_9 = arith.constant 0 : i32
    %11 = arith.cmpi ne, %10, %c0_i32_9 : i32
    scf.if %11 {
      %c0_10 = arith.constant 0 : index
      %c0_11 = arith.constant 0 : index
      %12 = vector.load %arg7[%c0_10, %c0_11] : memref<8x128xf32, #tpu.memory_space<vmem>>, vector<8x128xf32>
      %c0_12 = arith.constant 0 : index
      %c0_13 = arith.constant 0 : index
      %13 = vector.load %arg5[%c0_12, %c0_13] : memref<1x128xf32, #tpu.memory_space<vmem>>, vector<1x128xf32>
      %14 = vector.broadcast %13 : vector<1x128xf32> to vector<8x128xf32>
      %15 = arith.addf %12, %14 : vector<8x128xf32>
      %c0_14 = arith.constant 0 : index
      %c0_15 = arith.constant 0 : index
      %16 = vector.load %arg6[%c0_14, %c0_15] : memref<8x128xf32, #tpu.memory_space<vmem>>, vector<8x128xf32>
      tpu.vector_store %arg6[%c0_14, %c0_15], %15 {strides = array<i32>} : memref<8x128xf32, #tpu.memory_space<vmem>>, vector<8x128xf32>,
    } else {
    }
    return
  }
  func.func @transform_0(%arg0: i32, %arg1: i32, %arg2: i32) -> (i32, i32) {
    %c0_i32 = arith.constant 0 : i32
    return %arg0, %arg2 : i32, i32
  }
  func.func @transform_1(%arg0: i32, %arg1: i32, %arg2: i32) -> (i32, i32) {
    %c0_i32 = arith.constant 0 : i32
    return %arg1, %arg2 : i32, i32
  }
  func.func @transform_2(%arg0: i32, %arg1: i32, %arg2: i32) -> (i32, i32) {
    %c0_i32 = arith.constant 0 : i32
    %c0_i32_0 = arith.constant 0 : i32
    return %c0_i32, %arg1 : i32, i32
  }
  func.func @transform_3(%arg0: i32, %arg1: i32, %arg2: i32) -> (i32, i32) {
    %c0_i32 = arith.constant 0 : i32
    return %arg0, %arg1 : i32, i32
  }
}

</mosaic_0001>

<bundles_post_ra>
// kernel: classification_layer.1
= control target key start
LH: loop header
LB: loop body
LE: loop exit
PB: predicated region body
PF: predicated region fallthrough
CT: control target
= control target key end

     0   :  { %s151_s1 = inlined_call_operand.vmem [shape: f32[128,128], index: 1, kind: input, shape index: {}]   ;;  %s152_s2 = inlined_call_operand.vmem [shape: f32[1,128], index: 2, kind: input, shape index: {}]   ;;  %s153_s0 = inlined_call_operand.vmem [shape: f32[8,128], index: 0, kind: input, shape index: {}]   ;;  %s154_s3 = inlined_call_operand.vmem [shape: f32[8,128], index: 3, kind: output, shape index: {}]  }
   0x1   :  { %v36_v0 = vld [vmem:[%s151_s1 + $0x78] sm:$0xff]  ;;  %v35_v1 = vld [vmem:[%s151_s1 + $0x70] sm:$0xff]  ;;  %v34_v2 = vld [vmem:[%s151_s1 + $0x68] sm:$0xff] }
   0x2   :  { %37 = vmatpush.xpose.msra.mxu0 %v36_v0  ;;  %v33_v3 = vld [vmem:[%s151_s1 + $0x60] sm:$0xff]  ;;  %v32_v4 = vld [vmem:[%s151_s1 + $0x58] sm:$0xff]  ;;  %v31_v5 = vld [vmem:[%s151_s1 + $0x50] sm:$0xff] }
   0x3   :  { %v30_v6 = vld [vmem:[%s151_s1 + $0x48] sm:$0xff]  ;;  %v29_v7 = vld [vmem:[%s151_s1 + $0x40] sm:$0xff]  ;;  %v28_v8 = vld [vmem:[%s151_s1 + $0x38] sm:$0xff] }
   0x4   :  { %v27_v9 = vld [vmem:[%s151_s1 + $0x30] sm:$0xff]  ;;  %v26_v10 = vld [vmem:[%s151_s1 + $0x28] sm:$0xff]  ;;  %v25_v11 = vld [vmem:[%s151_s1 + $0x20] sm:$0xff] }
   0x5   :  { %v24_v12 = vld [vmem:[%s151_s1 + $0x18] sm:$0xff]  ;;  %v23_v13 = vld [vmem:[%s151_s1 + $0x10] sm:$0xff]  ;;  %v22_v14 = vld [vmem:[%s151_s1 + $0x8] sm:$0xff] }
   0x6   :  { %38 = vmatpush.xpose.msra.mxu0 %v35_v1  ;;  %v21_v15 = vld [vmem:[%s151_s1] sm:$0xff] }
   0x7   :  { %v20_v16 = vld [vmem:[%s153_s0] sm:$0xff] }
   0x8   :  { %v73_v17 = vld [vmem:[%s152_s2] ss:$0 sm:$0xff] }
   0xa   :  { %39 = vmatpush.xpose.msra.mxu0 %v34_v2 }
   0xe   :  { %40 = vmatpush.xpose.msra.mxu0 %v33_v3 }
  0x12   :  { %41 = vmatpush.xpose.msra.mxu0 %v32_v4 }
  0x16   :  { %42 = vmatpush.xpose.msra.mxu0 %v31_v5 }
  0x1a   :  { %43 = vmatpush.xpose.msra.mxu0 %v30_v6 }
  0x1e   :  { %44 = vmatpush.xpose.msra.mxu0 %v29_v7 }
  0x22   :  { %45 = vmatpush.xpose.msra.mxu0 %v28_v8 }
  0x26   :  { %46 = vmatpush.xpose.msra.mxu0 %v27_v9 }
  0x2a   :  { %47 = vmatpush.xpose.msra.mxu0 %v26_v10 }
  0x2e   :  { %48 = vmatpush.xpose.msra.mxu0 %v25_v11 }
  0x32   :  { %49 = vmatpush.xpose.msra.mxu0 %v24_v12 }
  0x36   :  { %50 = vmatpush.xpose.msra.mxu0 %v23_v13 }
  0x3a   :  { %51 = vmatpush.xpose.msra.mxu0 %v22_v14 }
  0x3e   :  { %52 = vmatpush.xpose.msra.mxu0 %v21_v15 }
  0x41   :  { %53 = vmatmul.f32.vlgmr.msra.gmra.mxu0 %v20_v16 }
  0xbe   :  { %v54_v18 = vpop.f32.mrf.mxu0 }
  0xbf   :  { %v67_v19 = vadd.f32 %v73_v17, %v54_v18 }
  0xc1   :  { %68 = vst [vmem:[%s154_s3] sm:$0xff] %v67_v19 }

</bundles_post_ra>
